<compile_context>
chip_gen: v6e
topology: v6e:2x2x1
jax: 0.10.0
libtpu: 0.0.40
codegen_flags: <defaults>
</compile_context>

<pallas_src>
import functools

import jax
import jax.numpy as jnp
from jax.experimental import pallas as pl
from jax.experimental.pallas import tpu as pltpu

_LANE = 128


def _rmsnorm_kernel(x_ref, w_ref, o_ref, *, eps, dim, fast_epilogue):
    # x_ref: (TM, Dp) tile of rows; w_ref: (1, Dp) f32 weight; o_ref: (TM, Dp).
    x = x_ref[...].astype(jnp.float32)
    # Padded columns (if any) are zero, so sum over the padded axis equals the
    # sum over the real dim; divide by the real dim (== mean over real dim).
    mean_sq = jnp.sum(x * x, axis=-1, keepdims=True) * (1.0 / dim)
    inv = jax.lax.rsqrt(mean_sq + eps)
    if fast_epilogue:
        # Single final cast (skips the x.dtype round trip). Opt-in.
        o_ref[...] = (x * inv * w_ref[...]).astype(o_ref.dtype)
    else:
        normed = (x * inv).astype(x_ref.dtype)               # .type_as(x)
        # f32 weight * normed -> f32 product like PyTorch; cast to out dtype.
        o_ref[...] = (w_ref[...] * normed.astype(jnp.float32)).astype(o_ref.dtype)


def _sublane_multiple(dtype):
    # 8 rows for 4-byte dtypes, 16 for 2-byte, 32 for 1-byte (packed sublanes).
    return max(8, 32 // jnp.dtype(dtype).itemsize)


def _tpu_info():
    """(physical VMEM bytes, TensorCores per chip) with conservative fallbacks."""
    vmem_bytes = 64 << 20      # conservative: v7x has 64 MiB; v5e/v6e have 128
    num_cores = 1              # v5e/v6e: 1 TC; v7x: 2 TCs
    try:
        info = pltpu.get_tpu_info()
        v = getattr(info, "vmem_capacity_bytes", None)
        if v:
            vmem_bytes = int(v)
        for name in ("num_tensorcores", "num_cores", "tensorcores_per_chip",
                     "cores_per_chip", "core_count"):
            c = getattr(info, name, None)
            if c:
                num_cores = int(c)
                break
    except Exception:
        pass
    return vmem_bytes, num_cores


def _choose_block_rows(n_rows, dim_p, x_dtype, out_itemsize,
                       target_block_bytes, phys_vmem, num_cores):
    sub = _sublane_multiple(x_dtype)
    if n_rows <= sub:
        # Single block equal to the full first dim (always a legal block shape).
        return n_rows
    in_item = jnp.dtype(x_dtype).itemsize
    # ~target bytes per x tile, rounded down to a sublane multiple.
    tm = max(sub, (target_block_bytes // max(1, dim_p * in_item)) // sub * sub)
    # VMEM cap: double-buffered in+out tiles plus ~2 live f32 temporaries
    # (x.astype(f32) and x*x) per element; keep total under ~70% of physical.
    bytes_per_row = dim_p * (2 * (in_item + out_itemsize) + 2 * 4)
    tm_vmem = max(sub, (int(0.7 * phys_vmem) // max(1, bytes_per_row)) // sub * sub)
    tm = min(tm, tm_vmem)
    # Only force multiple grid steps when there are multiple TensorCores
    # (v7x megacore). On v5e/v6e a single big tile avoids an extra ~0.35us
    # step and a ragged tail block.
    if num_cores >= 2:
        per_core = max(sub, (pl.cdiv(n_rows, num_cores) // sub) * sub)
        tm = min(tm, per_core)
    # Don't exceed the (sublane-rounded) number of rows that actually exist.
    tm = min(tm, max(sub, (n_rows // sub) * sub))
    return tm


def _balance_grid(n_rows, tm, sub, num_cores):
    """On multi-core chips, nudge tm so the step count is a core multiple."""
    if num_cores < 2 or tm >= n_rows:
        return tm
    steps = pl.cdiv(n_rows, tm)
    if steps % num_cores == 0:
        return tm
    target_steps = pl.cdiv(steps, num_cores) * num_cores
    tm2 = pl.cdiv(n_rows, target_steps)
    tm2 = max(sub, pl.cdiv(tm2, sub) * sub)
    if pl.cdiv(n_rows, tm2) % num_cores == 0:
        return tm2
    return tm


def rmsnorm(x, weight, eps=1e-6, *, out_dtype=None, block_rows=None,
            target_block_bytes=None, fast_epilogue=False, x_buffer_count=2):
    """RMSNorm over the last axis of x as a Pallas TPU kernel.

    out_dtype defaults to x.dtype (bandwidth-optimal). Pass out_dtype=float32
    to reproduce PyTorch's (f32 weight * low-precision x) dtype promotion.
    """
    orig_shape = x.shape
    dim = orig_shape[-1]
    assert weight.shape == (dim,)

    x2d = x.reshape(-1, dim)                    # (N, D)
    n_rows = x2d.shape[0]

    out_dtype = jnp.dtype(x.dtype if out_dtype is None else out_dtype)

    # Keep the last dim lane-dense: pad to a multiple of 128 so output stores
    # are unmasked vst (padded cols are zero and are sliced off afterwards).
    dim_p = pl.cdiv(dim, _LANE) * _LANE
    if dim_p != dim:
        x2d = jnp.pad(x2d, ((0, 0), (0, dim_p - dim)))
        w = jnp.pad(weight, (0, dim_p - dim))
    else:
        w = weight
    # Module weight is torch.ones(dim) -> f32; cast is exact here.
    w2d = w.reshape(1, dim_p).astype(jnp.float32)

    phys_vmem, num_cores = _tpu_info()
    if target_block_bytes is None:
        # ~4-8 MiB per x tile, scaled down on small-VMEM chips (v7x: 64 MiB).
        target_block_bytes = max(2 << 20, min(8 << 20, phys_vmem // 12))

    sub = _sublane_multiple(x2d.dtype)
    if block_rows is None:
        tm = _choose_block_rows(n_rows, dim_p, x2d.dtype, out_dtype.itemsize,
                                target_block_bytes, phys_vmem, num_cores)
    else:
        tm = min(int(block_rows), n_rows)
        if tm < n_rows:
            tm = max(sub, (tm // sub) * sub)
    tm = _balance_grid(n_rows, tm, sub, num_cores)

    grid = (pl.cdiv(n_rows, tm),)

    in_item = jnp.dtype(x2d.dtype).itemsize
    # VMEM budget: double-buffered x + out tiles, ~2 f32 temporaries live
    # across the lane reduction, shared weight, plus headroom.
    vmem_needed = (2 * tm * dim_p * (in_item + out_dtype.itemsize)
                   + 2 * tm * dim_p * 4
                   + 2 * dim_p * 4)
    vmem_limit = int(min(phys_vmem, max(vmem_needed + (8 << 20), 16 << 20)))

    x_spec_kwargs = {}
    if x_buffer_count and x_buffer_count != 2:
        # Opt-in deeper pipelining (e.g. 3 on v7x if a DMA bubble shows up).
        x_spec_kwargs["pipeline_mode"] = pl.Buffered(int(x_buffer_count))
    x_spec = pl.BlockSpec((tm, dim_p), lambda i: (i, 0), **x_spec_kwargs)

    out = pl.pallas_call(
        functools.partial(_rmsnorm_kernel, eps=float(eps), dim=dim,
                          fast_epilogue=fast_epilogue),
        out_shape=jax.ShapeDtypeStruct((n_rows, dim_p), out_dtype),
        grid_spec=pltpu.PrefetchScalarGridSpec(
            num_scalar_prefetch=0,
            grid=grid,
            in_specs=[
                x_spec,                                      # x rows tile
                pl.BlockSpec((1, dim_p), lambda i: (0, 0)),  # weight (shared)
            ],
            out_specs=pl.BlockSpec((tm, dim_p), lambda i: (i, 0)),
        ),
        compiler_params=pltpu.CompilerParams(
            dimension_semantics=("parallel",),
            vmem_limit_bytes=vmem_limit),
    )(x2d, w2d)

    if dim_p != dim:
        out = out[:, :dim]
    return out.reshape(orig_shape[:-1] + (dim,))


def rmsnorm_ref(x, weight, eps=1e-6):
    xf = x.astype(jnp.float32)
    normed = (xf * jax.lax.rsqrt(
        jnp.mean(xf * xf, axis=-1, keepdims=True) + eps)).astype(x.dtype)
    return weight.astype(jnp.float32) * normed.astype(jnp.float32)


if __name__ == "__main__":
    key = jax.random.PRNGKey(0)

    # Main test: small transformer-ish shape, f32 (matches PyTorch exactly).
    batch, seq, dim = 2, 8, 128
    x = jax.random.normal(key, (batch, seq, dim), dtype=jnp.float32)
    weight = jnp.ones((dim,), dtype=jnp.float32)   # nn.Parameter(torch.ones(dim))

    y = jax.block_until_ready(rmsnorm(x, weight, eps=1e-6))
    y_ref = rmsnorm_ref(x, weight, eps=1e-6)
    assert y.shape == x.shape
    assert y.dtype == jnp.float32
    assert jnp.allclose(y, y_ref, atol=1e-5, rtol=1e-5)

    # Ragged row count (not a multiple of the row tile) — exercises cdiv grid,
    # no host-side padding or output slicing of rows.
    k2 = jax.random.PRNGKey(1)
    x_ragged = jax.random.normal(k2, (3, 5, dim), dtype=jnp.float32)
    y_ragged = jax.block_until_ready(rmsnorm(x_ragged, weight))
    assert jnp.allclose(y_ragged, rmsnorm_ref(x_ragged, weight),
                        atol=1e-5, rtol=1e-5)

    # bf16 input: default out_dtype is bf16 (bandwidth-optimal path).
    x_bf16 = x.astype(jnp.bfloat16)
    y_bf16 = jax.block_until_ready(rmsnorm(x_bf16, weight))
    assert y_bf16.dtype == jnp.bfloat16
    ref_bf16 = rmsnorm_ref(x_bf16, weight).astype(jnp.bfloat16)
    assert jnp.allclose(y_bf16.astype(jnp.float32),
                        ref_bf16.astype(jnp.float32), atol=2e-2, rtol=2e-2)

    # bf16 input with the exact PyTorch dtype promotion (f32 output), opt-in.
    y_bf16_f32 = jax.block_until_ready(
        rmsnorm(x_bf16, weight, out_dtype=jnp.float32))
    assert y_bf16_f32.dtype == jnp.float32
    assert jnp.allclose(y_bf16_f32, rmsnorm_ref(x_bf16, weight),
                        atol=2e-2, rtol=2e-2)

    # dim not a multiple of 128 — exercises the lane-dense padding path.
    k3 = jax.random.PRNGKey(2)
    dim_odd = 96
    x_odd = jax.random.normal(k3, (2, 4, dim_odd), dtype=jnp.float32)
    w_odd = jnp.ones((dim_odd,), dtype=jnp.float32)
    y_odd = jax.block_until_ready(rmsnorm(x_odd, w_odd))
    assert y_odd.shape == x_odd.shape
    assert jnp.allclose(y_odd, rmsnorm_ref(x_odd, w_odd), atol=1e-5, rtol=1e-5)

    print("KERNEL_OK")
</pallas_src>

<mosaic_0001>
module attributes {stable_mosaic.version = 11 : i64} {
  func.func @_rmsnorm_kernel(%arg0: i32, %arg1: memref<16x128xf32, #tpu.memory_space<vmem>>, %arg2: memref<1x128xf32, #tpu.memory_space<vmem>>, %arg3: memref<16x128xf32, #tpu.memory_space<vmem>>) attributes {dimension_semantics = [#tpu.dimension_semantics<parallel>], iteration_bounds = array<i64: 1>, scalar_prefetch = 0 : i64, scratch_operands = 0 : i64, tpu.core_type = #tpu.core_type<tc>, window_params = [{transform_indices = @transform_0, window_bounds = array<i64: 16, 128>}, {pipeline_mode = #tpu.pipeline_mode<synchronous>, transform_indices = @transform_1, window_bounds = array<i64: 1, 128>}, {transform_indices = @transform_2, window_bounds = array<i64: 16, 128>}]} {
    %c0 = arith.constant 0 : index
    %c0_0 = arith.constant 0 : index
    %0 = vector.load %arg1[%c0, %c0_0] : memref<16x128xf32, #tpu.memory_space<vmem>>, vector<16x128xf32>
    %1 = arith.mulf %0, %0 : vector<16x128xf32>
    %cst = arith.constant dense<0.000000e+00> : vector<16xf32>
    %2 = vector.multi_reduction <add>, %1, %cst [1] : vector<16x128xf32> to vector<16xf32>
    %3 = vector.shape_cast %2 : vector<16xf32> to vector<16x1xf32>
    %cst_1 = arith.constant 7.812500e-03 : f32
    %4 = vector.broadcast %cst_1 : f32 to vector<16x1xf32>
    %5 = arith.mulf %3, %4 : vector<16x1xf32>
    %cst_2 = arith.constant 9.99999997E-7 : f32
    %6 = vector.broadcast %cst_2 : f32 to vector<16x1xf32>
    %7 = arith.addf %5, %6 : vector<16x1xf32>
    %8 = math.rsqrt %7 : vector<16x1xf32>
    %9 = vector.broadcast %8 : vector<16x1xf32> to vector<16x128xf32>
    %10 = arith.mulf %0, %9 : vector<16x128xf32>
    %c0_3 = arith.constant 0 : index
    %c0_4 = arith.constant 0 : index
    %11 = vector.load %arg2[%c0_3, %c0_4] : memref<1x128xf32, #tpu.memory_space<vmem>>, vector<1x128xf32>
    %12 = vector.broadcast %11 : vector<1x128xf32> to vector<16x128xf32>
    %13 = arith.mulf %12, %10 : vector<16x128xf32>
    %c0_5 = arith.constant 0 : index
    %c0_6 = arith.constant 0 : index
    %14 = vector.load %arg3[%c0_5, %c0_6] : memref<16x128xf32, #tpu.memory_space<vmem>>, vector<16x128xf32>
    tpu.vector_store %arg3[%c0_5, %c0_6], %13 {strides = array<i32>} : memref<16x128xf32, #tpu.memory_space<vmem>>, vector<16x128xf32>,
    return
  }
  func.func @transform_0(%arg0: i32) -> (i32, i32) {
    %c0_i32 = arith.constant 0 : i32
    %c0_i32_0 = arith.constant 0 : i32
    return %arg0, %c0_i32 : i32, i32
  }
  func.func @transform_1(%arg0: i32) -> (i32, i32) {
    %c0_i32 = arith.constant 0 : i32
    %c0_i32_0 = arith.constant 0 : i32
    %c0_i32_1 = arith.constant 0 : i32
    return %c0_i32, %c0_i32_0 : i32, i32
  }
  func.func @transform_2(%arg0: i32) -> (i32, i32) {
    %c0_i32 = arith.constant 0 : i32
    %c0_i32_0 = arith.constant 0 : i32
    return %arg0, %c0_i32 : i32, i32
  }
}

</mosaic_0001>

<bundles_post_ra>
// kernel: tpu_custom_call.1
= control target key start
LH: loop header
LB: loop body
LE: loop exit
PB: predicated region body
PF: predicated region fallthrough
CT: control target
= control target key end

     0   :  { %7 = vsyncpa [#allocation3], 0  ;;  %s157_s0 = inlined_call_operand.hbm [shape: f32[16,128], index: 0, kind: input, shape index: {}]   ;;  %s158_s1 = inlined_call_operand.vmem [shape: f32[1,128], index: 1, kind: input, shape index: {}]   ;;  %s159_s2 = inlined_call_operand.hbm [shape: f32[16,128], index: 2, kind: output, shape index: {}]  }
   0x1   :  { %8 = vsyncpa [#allocation4], 0  ;;  %s123_s9 = smov [#allocation2]  }
   0x2   :  { %s14_s10 = sshll.u32 %s123_s9, 4  ;;  %s15_s10 = int_to_ptr.vmem [resolvable:$true] %s14_s10 }
   0x3   :  { %s87_s11 = scalar_lea.vmem %s15_s10, 256  ;;  %p92_p1 = scmp.lt.s32.totalorder %s15_s10, %s15_s10 }
   0x4   :  { %p88_p0 = scmp.ne.s32.totalorder %s15_s10, %s87_s11  ;;  %p93_p2 = scmp.lt.s32.totalorder %s87_s11, %s87_s11 }
   0x6   :  { %p94_p3 = por %p93_p2, %p92_p1 }
   0x8   :  { %p95_p4 = pnand %p94_p3, %p88_p0 }
   0xa   :  { %98 = shalt.err (!%p95_p4)
}
   0xb   :  { %s124_s12 = smov 128   ;;  %s125_s13 = smov 8  }
   0xc   :  { %20 = dma.hbm_to_vmem [thread:$0]  %s157_s0, 256, %s15_s10, [#allocation3], %s124_s12, %s124_s12, %s125_s13  }
   0xd   :  { %119 = dma.done.wait [#allocation3], 256  }
   0xe   :  { %120 = vsyncadd [#allocation3], 4294967040  ;;  %v26_v0 = vld [vmem:[#allocation2] sm:$0xff]  ;;  %v27_v1 = vld [vmem:[#allocation2 + $0x8] sm:$0xff]  ;;  %s126_s0 = smov [#allocation5]  }
   0xf   :  { %v28_v2 = vmul.f32 %v26_v0, %v26_v0  ;;  %v29_v3 = vmul.f32 %v27_v1, %v27_v1  ;;  %v70_v11 = vld [vmem:[%s158_s1] ss:$0 sm:$0xff]  ;;  %s58_s18 = sshll.u32 %s126_s0, 4  ;;  %s59_s18 = int_to_ptr.vmem [resolvable:$true] %s58_s18 }
  0x10   :  { %s99_s19 = scalar_lea.vmem %s59_s18, 256  ;;  %p104_p6 = scmp.lt.s32.totalorder %s59_s18, %s59_s18 }
  0x11   :  { %30 = vadd.xlane.f32.xlu0 %v28_v2  ;;  %p100_p5 = scmp.ne.s32.totalorder %s59_s18, %s99_s19  ;;  %p105_p7 = scmp.lt.s32.totalorder %s99_s19, %s99_s19 }
  0x13   :  { %p106_p8 = por %p105_p7, %p104_p6 }
  0x15   :  { %32 = vadd.xlane.f32.xlu0 %v29_v3  ;;  %p107_p9 = pnand %p106_p8, %p100_p5 }
  0x9a   :  { %v31_v4 = vpop.xlane.xlu0 %30 }
  0x9b   :  { %v34_v5 = vmul.f32 0.0078125, %v31_v4 }
  0x9d   :  { %v36_v6 = vadd.f32 1e-06, %v34_v5 }
  0x9e   :  { %v33_v7 = vpop.xlane.xlu0 %32 }
  0x9f   :  { %75 = vrsqrt.f32 %v36_v6  ;;  %v35_v8 = vmul.f32 0.0078125, %v33_v7 }
  0xa1   :  { %v37_v9 = vadd.f32 1e-06, %v35_v8 }
  0xa3   :  { %77 = vrsqrt.f32 %v37_v9 }
  0xac   :  { %v76_v10 = vpop.eup %75 }
  0xad   :  { %v40_v12 = vmul.f32 %v76_v10, %v26_v0 }
  0xaf   :  { %v49_v13 = vmul.f32 %v70_v11, %v40_v12 }
  0xb0   :  { %v78_v14 = vpop.eup %77 }
  0xb1   :  { %v41_v15 = vmul.f32 %v78_v14, %v27_v1  ;;  %51 = vst [vmem:[#allocation5] sm:$0xff] %v49_v13 }
  0xb3   :  { %v50_v16 = vmul.f32 %v70_v11, %v41_v15 }
  0xb5   :  { %52 = vst [vmem:[#allocation5 + $0x8] sm:$0xff] %v50_v16 }
  0xb6   :  { %110 = shalt.err (!%p107_p9)
}
  0xb7   :  { %64 = dma.vmem_to_hbm [thread:$0]  %s59_s18, 256, %s159_s2, [#allocation4], %s124_s12, %s124_s12, %s125_s13  }
  0xb8   :  { %121 = dma.done.wait [#allocation4], 256  }
  0xb9   :  { %122 = vsyncadd [#allocation4], 4294967040 }
  0xba   :  { %68 = vsyncpa [#allocation3], 1 }
  0xbb   :  { %69 = vsyncpa [#allocation4], 1 }

</bundles_post_ra>
